<compile_context>
chip_gen: v7x
topology: tpu7x:2x2x1
jax: 0.10.0
libtpu: 0.0.40
codegen_flags: <defaults>
</compile_context>

<pallas_src>
import numpy as np
import jax
import jax.numpy as jnp
from jax.experimental import pallas as pl
from jax.experimental.pallas import tpu as pltpu

_LANES = 128


def partial_relu_kernel(bound_ref, x_ref, o_ref):
    # bound_ref: (1, tile_c) broadcasts over the row tile -> a single VPU vmax.
    o_ref[...] = jnp.maximum(x_ref[...], bound_ref[...])


def _vmem_budget():
    """(per-block byte budget, explicit scoped-VMEM limit) per TPU generation."""
    try:
        cap = pltpu.get_tpu_info().vmem_capacity_bytes
    except Exception:
        cap = 0
    if cap and cap <= (64 << 20):      # v7x-class: 64 MiB VMEM per TensorCore
        return 6 << 20, 36 << 20
    if cap >= (100 << 20):             # v5e / v6e: 128 MiB physical VMEM
        return 8 << 20, 44 << 20
    return 4 << 20, 24 << 20           # unknown chip: stay conservative


def partial_relu(x, bound_eff, *, donate=False):
    """x: (N, C); bound_eff: (C,), same dtype as x, with a sentinel
    (-inf for floats / dtype-min for ints) on unselected features so the
    kernel body is a single jnp.maximum (no mask stream, no select)."""
    N, C = x.shape
    dtype = x.dtype
    itemsize = jnp.dtype(dtype).itemsize
    block_budget, vmem_limit = _vmem_budget()
    sub = max(8, 32 // itemsize)       # sublane multiple for this dtype

    # ---- Layout: lane-pack small C only when it is a free reshape.  Never
    # pad / concatenate / slice x (each is an extra full HBM pass on a purely
    # bandwidth-bound op).
    if C < _LANES and _LANES % C == 0 and N % (_LANES // C) == 0:
        pack = _LANES // C
        rows, Cp = N // pack, _LANES
        x2 = x.reshape(rows, Cp)                        # metadata-only reshape
        b2 = jnp.tile(bound_eff, pack).reshape(1, Cp)   # tiny (128 elements)
        unpack = lambda y: y.reshape(N, C)
    else:
        # Either already lane-dense (C % 128 == 0) or ragged: a block width
        # equal to the full C is legal; tail vregs just use masked stores.
        rows, Cp = N, C
        x2 = x
        b2 = bound_eff.reshape(1, C)
        unpack = lambda y: y

    # ---- Feature tile: prefer full width (contiguous DMA rows, bound tile
    # fetched once per row tile); only split a huge C.
    if Cp <= _LANES or Cp * itemsize * sub <= block_budget:
        tile_c = Cp
    else:
        tile_c = min(
            Cp,
            max(_LANES, (block_budget // (sub * itemsize)) // _LANES * _LANES))

    # ---- Row tile: as large as the block budget allows ...
    max_rows = max(sub, (block_budget // (tile_c * itemsize)) // sub * sub)
    tile_r = min(rows, max_rows)
    # ... but guarantee >= 2-4 steps along the parallel row axis for non-tiny
    # inputs so v7x's two TensorCores are both engaged and fetch/compute/
    # writeback overlap is restored.
    total_bytes = rows * Cp * itemsize
    if total_bytes > (512 << 10) and rows > 2 * sub:
        min_steps = 4 if rows >= 4 * sub else 2
        cap = pl.cdiv(pl.cdiv(rows, min_steps), sub) * sub
        tile_r = min(tile_r, max(sub, cap))

    # Feature axis outer -> the (1, tile_c) bound block index is constant
    # across the inner row loop.
    grid = (pl.cdiv(Cp, tile_c), pl.cdiv(rows, tile_r))

    out = pl.pallas_call(
        partial_relu_kernel,
        out_shape=jax.ShapeDtypeStruct((rows, Cp), dtype),
        grid_spec=pltpu.PrefetchScalarGridSpec(
            num_scalar_prefetch=0,
            grid=grid,
            in_specs=[
                pl.BlockSpec((1, tile_c), lambda j, i: (0, j)),       # bound
                pl.BlockSpec((tile_r, tile_c), lambda j, i: (i, j)),  # x
            ],
            out_specs=pl.BlockSpec((tile_r, tile_c), lambda j, i: (i, j)),
        ),
        input_output_aliases=({1: 0} if donate else {}),
        compiler_params=pltpu.CompilerParams(
            dimension_semantics=("parallel", "parallel"),
            vmem_limit_bytes=vmem_limit),
    )(b2, x2)
    return unpack(out)


class PartialReLUPallas:
    """Mirrors PartialReLU.__init__(size, dims, bound)."""

    def __init__(self, size, dims, bound=0):
        dims_arr = np.asarray(dims)
        self.size = size
        self.mask = np.zeros(size, dtype=bool)
        self.mask[dims_arr] = True
        bvals = np.zeros(size, dtype=np.float64)
        if isinstance(bound, list):
            b = list(bound)
            if len(b) < len(dims):
                b = b + [0] * (len(dims) - len(b))
            bvals[dims_arr] = np.asarray(b[:len(dims)], dtype=np.float64)
        else:
            bvals[dims_arr] = float(bound)
        self._bvals = bvals
        self._bound_cache = {}

    def _bound_for(self, dtype):
        """Effective bound vector in x's dtype: bound where selected,
        -inf (floats) / dtype-min (ints) elsewhere -> max() is a no-op there."""
        dtype = jnp.dtype(dtype)
        key = str(dtype)
        if key not in self._bound_cache:
            if jnp.issubdtype(dtype, jnp.floating):
                sentinel = -np.inf
            else:
                sentinel = np.iinfo(dtype).min
            b = np.where(self.mask, self._bvals, sentinel)
            self._bound_cache[key] = jnp.asarray(b, dtype=dtype)
        return self._bound_cache[key]

    def __call__(self, x, donate=False):
        # TODO(synk): PyTorch mutates `l` in place; JAX is functional, so we
        # return a new array (pass donate=True to alias x into the output).
        return partial_relu(x, self._bound_for(x.dtype), donate=donate)


def _reference(x, size, dims, bound):
    mask = np.zeros(size, dtype=bool)
    mask[np.asarray(dims)] = True
    bvec = np.zeros(size, dtype=np.float64)
    if isinstance(bound, list):
        b = list(bound)
        if len(b) < len(dims):
            b = b + [0] * (len(dims) - len(b))
        bvec[np.asarray(dims)] = np.asarray(b[:len(dims)], dtype=np.float64)
    else:
        bvec[np.asarray(dims)] = float(bound)
    bvec = jnp.asarray(bvec, dtype=x.dtype)
    return jnp.where(jnp.asarray(mask)[None, :],
                     jnp.maximum(x, bvec[None, :]), x)


if __name__ == "__main__":
    key = jax.random.PRNGKey(0)
    k1, k2, k3 = jax.random.split(key, 3)

    # Case 1: small C -> free lane-packing (C=32, pack=4, N % pack == 0).
    N, C = 8, 32
    dims = list(range(16))
    x = jax.random.normal(k1, (N, C), dtype=jnp.float32)
    mod = PartialReLUPallas(C, dims, 0.0)
    out = jax.block_until_ready(mod(x))
    ref = _reference(x, C, dims, 0.0)
    assert out.shape == x.shape and out.dtype == x.dtype
    np.testing.assert_array_equal(np.asarray(out), np.asarray(ref))

    # Case 2: ragged feature axis (C=40) + list bound shorter than dims ->
    # full-width ragged block (masked tail stores), no pad/slice of x.
    N2, C2 = 5, 40
    dims2 = [1, 3, 5, 7]
    x2 = jax.random.normal(k2, (N2, C2), dtype=jnp.float32)
    mod2 = PartialReLUPallas(C2, dims2, [0.5, -0.25])
    out2 = jax.block_until_ready(mod2(x2))
    ref2 = _reference(x2, C2, dims2, [0.5, -0.25])
    np.testing.assert_array_equal(np.asarray(out2), np.asarray(ref2))

    # Case 3: bf16, lane-dense C (multiple of 128) -> 16-row sublane rounding.
    N3, C3 = 48, 256
    dims3 = [0, 5, 130, 255]
    x3 = jax.random.normal(k3, (N3, C3), dtype=jnp.bfloat16)
    mod3 = PartialReLUPallas(C3, dims3, -0.1)
    out3 = jax.block_until_ready(mod3(x3))
    ref3 = _reference(x3, C3, dims3, -0.1)
    np.testing.assert_array_equal(
        np.asarray(jnp.asarray(out3, jnp.float32)),
        np.asarray(jnp.asarray(ref3, jnp.float32)))

    print("KERNEL_OK")
</pallas_src>

<mosaic_0001>
module attributes {stable_mosaic.version = 11 : i64} {
  func.func @partial_relu_kernel(%arg0: i32, %arg1: i32, %arg2: memref<1x128xf32, #tpu.memory_space<vmem>>, %arg3: memref<2x128xf32, #tpu.memory_space<vmem>>, %arg4: memref<2x128xf32, #tpu.memory_space<vmem>>) attributes {dimension_semantics = [#tpu.dimension_semantics<parallel>, #tpu.dimension_semantics<parallel>], iteration_bounds = array<i64: 1, 1>, scalar_prefetch = 0 : i64, scratch_operands = 0 : i64, tpu.core_type = #tpu.core_type<tc>, window_params = [{transform_indices = @transform_0, window_bounds = array<i64: 1, 128>}, {transform_indices = @transform_1, window_bounds = array<i64: 2, 128>}, {transform_indices = @transform_2, window_bounds = array<i64: 2, 128>}]} {
    %c0 = arith.constant 0 : index
    %c0_0 = arith.constant 0 : index
    %0 = vector.load %arg3[%c0, %c0_0] : memref<2x128xf32, #tpu.memory_space<vmem>>, vector<2x128xf32>
    %c0_1 = arith.constant 0 : index
    %c0_2 = arith.constant 0 : index
    %1 = vector.load %arg2[%c0_1, %c0_2] : memref<1x128xf32, #tpu.memory_space<vmem>>, vector<1x128xf32>
    %2 = vector.broadcast %1 : vector<1x128xf32> to vector<2x128xf32>
    %3 = arith.maximumf %0, %2 : vector<2x128xf32>
    %c0_3 = arith.constant 0 : index
    %c0_4 = arith.constant 0 : index
    %4 = vector.load %arg4[%c0_3, %c0_4] : memref<2x128xf32, #tpu.memory_space<vmem>>, vector<2x128xf32>
    tpu.vector_store %arg4[%c0_3, %c0_4], %3 {strides = array<i32>} : memref<2x128xf32, #tpu.memory_space<vmem>>, vector<2x128xf32>,
    return
  }
  func.func @transform_0(%arg0: i32, %arg1: i32) -> (i32, i32) {
    %c0_i32 = arith.constant 0 : i32
    %c0_i32_0 = arith.constant 0 : i32
    return %c0_i32, %arg0 : i32, i32
  }
  func.func @transform_1(%arg0: i32, %arg1: i32) -> (i32, i32) {
    %c0_i32 = arith.constant 0 : i32
    return %arg1, %arg0 : i32, i32
  }
  func.func @transform_2(%arg0: i32, %arg1: i32) -> (i32, i32) {
    %c0_i32 = arith.constant 0 : i32
    return %arg1, %arg0 : i32, i32
  }
}

</mosaic_0001>

<bundles_post_ra>
// kernel: tpu_custom_call.1
= control target key start
LH: loop header
LB: loop body
LE: loop exit
PB: predicated region body
PF: predicated region fallthrough
CT: control target
= control target key end

     0   :  { %7 = vsyncpa [#allocation3], 0  ;;  %s144_s0 = inlined_call_operand.hbm [shape: f32[1,128], index: 0, kind: input, shape index: {}]   ;;  %s145_s1 = inlined_call_operand.vmem [shape: f32[2,128], index: 1, kind: input, shape index: {}]   ;;  %s146_s2 = inlined_call_operand.hbm [shape: f32[2,128], index: 2, kind: output, shape index: {}]  }
   0x1   :  { %8 = vsyncpa [#allocation4], 0  ;;  %s100_s9 = smov [#allocation2]   ;;  %s52_s13 = scalar_lea.hbm %s144_s0, 16 }
   0x2   :  { %s15_s10 = sshll.u32 %s100_s9, 4  ;;  %p53_p0 = scmp.ne.s32.totalorder %s144_s0, %s52_s13  ;;  %s16_s10 = int_to_ptr.vmem [resolvable:$true] %s15_s10 }
   0x3   :  { %p56_p1 = scmp.lt.u32.totalorder %s52_s13, %s144_s0 }
   0x5   :  { %p58_p2 = pnand %p56_p1, %p53_p0 }
   0x7   :  { %61 = shalt.err (!%p58_p2)
}
   0x8   :  { %s62_s18 = scalar_lea.vmem %s16_s10, 16  ;;  %s66_s19 = scalar_lea.vmem %s16_s10, 32 }
   0x9   :  { %p63_p3 = scmp.ne.s32.totalorder %s16_s10, %s62_s18  ;;  %p67_p4 = scmp.lt.s32.totalorder %s16_s10, %s16_s10 }
   0xa   :  { %p68_p5 = scmp.lt.s32.totalorder %s66_s19, %s62_s18 }
   0xc   :  { %p69_p6 = por %p68_p5, %p67_p4 }
   0xe   :  { %p70_p7 = pnand %p69_p6, %p63_p3 }
  0x10   :  { %73 = shalt.err (!%p70_p7)
}
  0x11   :  { %18 = dma.hbm_to_vmem [thread:$0]  %s144_s0, 16, %s16_s10, [#allocation3]  }
  0x12   :  { %96 = dma.done.wait [#allocation3], 16  }
  0x13   :  { %97 = vsyncadd [#allocation3], 4294967280  ;;  %s101_s22 = smov [#allocation5]   ;;  %v24_v0 = vld [vmem:[%s145_s1] sm:$0x3] }
  0x14   :  { %s40_s23 = sshll.u32 %s101_s22, 4  ;;  %v49_v1 = vld [vmem:[#allocation2] ss:$0 sm:$0xff]  ;;  %s41_s23 = int_to_ptr.vmem [resolvable:$true] %s40_s23 }
  0x15   :  { %v32_v2 = vmax.f32 %v24_v0, %v49_v1  ;;  %s74_s26 = scalar_lea.vmem %s41_s23, 32  ;;  %p79_p9 = scmp.lt.s32.totalorder %s41_s23, %s41_s23 }
  0x16   :  { %p75_p8 = scmp.ne.s32.totalorder %s41_s23, %s74_s26  ;;  %p80_p10 = scmp.lt.s32.totalorder %s74_s26, %s74_s26 }
  0x17   :  { %33 = vst [vmem:[#allocation5] sm:$0x3] %v32_v2 }
  0x18   :  { %p81_p11 = por %p80_p10, %p79_p9 }
  0x1a   :  { %p82_p12 = pnand %p81_p11, %p75_p8 }
  0x1c   :  { %85 = shalt.err (!%p82_p12)
}
  0x1d   :  { %s86_s28 = scalar_lea.hbm %s146_s2, 32 }
  0x1e   :  { %p87_p13 = scmp.ne.s32.totalorder %s146_s2, %s86_s28  ;;  %p90_p0 = scmp.lt.u32.totalorder %s86_s28, %s146_s2 }
  0x20   :  { %p92_p1 = pnand %p90_p0, %p87_p13 }
  0x22   :  { %95 = shalt.err (!%p92_p1)
}
  0x23   :  { %43 = dma.vmem_to_hbm [thread:$0]  %s41_s23, 32, %s146_s2, [#allocation4]  }
  0x24   :  { %98 = dma.done.wait [#allocation4], 32  }
  0x25   :  { %99 = vsyncadd [#allocation4], 4294967264 }
  0x26   :  { %47 = vsyncpa [#allocation3], 1 }
  0x27   :  { %48 = vsyncpa [#allocation4], 1 }

</bundles_post_ra>
